<compile_context>
chip_gen: v7x
topology: tpu7x:2x2x1
jax: 0.10.0
libtpu: 0.0.40
codegen_flags: <defaults>
</compile_context>

<pallas_src>
import jax
import jax.numpy as jnp
from jax import lax
from jax.experimental import pallas as pl
from jax.experimental.pallas import tpu as pltpu

LANES = 128  # lane-dense single-step output slab width


# ---------------------------------------------------------------------------
# Single-step kernel (matches MyModel.forward exactly)
# ---------------------------------------------------------------------------
def _lstm_step_kernel(x_ref, xd_ref, h_ref, c_ref,
                      wih_ref, whh_ref, b_ref, hcsel_ref, fcb_ref,
                      slab_ref):
    """Fused LSTM step (+ x_d cell decay) + fc, lane-dense 128-wide output slab.

    Shapes (all VMEM, no grid):
      x     : (B, I)
      xd    : (B, 1)
      h     : (B, H)
      c     : (B, H)
      wih   : (I, 4H)
      whh   : (H, 4H)
      b     : (1, 4H)        b_ih + b_hh
      hcsel : (2H, 128)      rows 0:H  -> cols 0:I = fc_w_T, cols I:I+H = eye(H)
                             rows H:2H -> cols I+H:I+2H = eye(H)
      fcb   : (1, 128)       lanes 0:I = fc_b, rest 0
      slab  : (B, 128)       lanes 0:I = fc(out), I:I+H = h_new, I+H:I+2H = c_new
    """
    H = h_ref.shape[-1]
    gates = (jnp.dot(x_ref[...], wih_ref[...], preferred_element_type=jnp.float32)
             + jnp.dot(h_ref[...], whh_ref[...], preferred_element_type=jnp.float32)
             + b_ref[...])

    i_g = jax.nn.sigmoid(gates[:, 0 * H:1 * H])
    f_g = jax.nn.sigmoid(gates[:, 1 * H:2 * H])
    g_g = jnp.tanh(gates[:, 2 * H:3 * H])
    o_g = jax.nn.sigmoid(gates[:, 3 * H:4 * H])

    c_new = f_g * (c_ref[...] * xd_ref[...]) + i_g * g_g
    h_new = o_g * jnp.tanh(c_new)

    # Single merged placement matmul: [h_new | c_new] @ (2H, 128) selector places
    # fc(out), h_new and c_new into one lane-dense slab -> one unmasked 128-wide
    # store instead of three masked sub-lane stores.
    hc = jnp.concatenate([h_new, c_new], axis=-1)  # (B, 2H)
    slab_ref[...] = (jnp.dot(hc, hcsel_ref[...], preferred_element_type=jnp.float32)
                     + fcb_ref[...])


def my_model_forward(x, x_d, hidden, cell, params):
    """Mirrors MyModel.forward(x, x_d, hidden, cell) -> (out, hidden, cell)."""
    B, I = x.shape
    H = hidden.shape[-1]
    c2d = cell.reshape(B, H)  # squeeze the leading (1, B, H) layer dim

    vmem = pl.BlockSpec(memory_space=pltpu.MemorySpace.VMEM)
    flops = 2 * B * I * 4 * H + 2 * B * H * 4 * H + 2 * B * (2 * H) * LANES
    bytes_accessed = 4 * (B * I + B + 2 * B * H + I * 4 * H + H * 4 * H + 4 * H
                          + 2 * H * LANES + LANES + B * LANES)

    slab = pl.pallas_call(
        _lstm_step_kernel,
        out_shape=jax.ShapeDtypeStruct((B, LANES), jnp.float32),
        in_specs=[vmem] * 9,
        out_specs=vmem,
        cost_estimate=pl.CostEstimate(flops=flops,
                                      transcendentals=5 * B * H,
                                      bytes_accessed=bytes_accessed),
    )(x, x_d, hidden, c2d,
      params["w_ih_T"], params["w_hh_T"], params["b"],
      params["hc_sel"], params["fcb_pad"])

    out = slab[:, :I]
    h_new = slab[:, I:I + H]
    c_new = slab[:, I + H:I + 2 * H]
    # Shapes match MyModel.init_hidden: hidden (B, H), cell (1, B, H).
    return out, h_new, c_new.reshape(1, B, H)


# ---------------------------------------------------------------------------
# Fused time-loop kernel: the Pallas kernel runs ONLY the serial recurrence
# (h @ w_hh_T + gate elementwise), TB timesteps per grid step, h/c carried in
# VMEM scratch.  Input / fc projections are hoisted out as batched matmuls.
# ---------------------------------------------------------------------------
def _lstm_seq_kernel(xg_ref, xd_ref, h0_ref, c0_ref, whh_ref,
                     hs_ref, cT_ref, h_sc, c_sc):
    """One grid step = TB recurrent timesteps.

    xg  : (TB, B, 4H)  precomputed x_t @ w_ih_T + bias (hoisted out of the loop)
    xd  : (TB, B, 1)   per-step cell decay
    h0/c0 : (B, H)     initial state (resident, read only at block 0)
    whh : (H, 4H)      recurrent weight (VMEM-resident across the whole grid)
    hs  : (TB, B, H)   per-step hidden states (fc applied in a post-pass)
    cT  : (B, H)       final cell state (resident output)
    """
    blk = pl.program_id(0)

    @pl.when(blk == 0)
    def _():
        h_sc[...] = h0_ref[...]
        c_sc[...] = c0_ref[...]

    H = h0_ref.shape[-1]
    TB = xg_ref.shape[0]
    whh = whh_ref[...]  # hoisted load, reused by every unrolled step

    def step(t, carry):
        h, c = carry
        gates = xg_ref[t] + jnp.dot(h, whh, preferred_element_type=jnp.float32)
        i_g = jax.nn.sigmoid(gates[:, 0 * H:1 * H])
        f_g = jax.nn.sigmoid(gates[:, 1 * H:2 * H])
        g_g = jnp.tanh(gates[:, 2 * H:3 * H])
        o_g = jax.nn.sigmoid(gates[:, 3 * H:4 * H])
        c_new = f_g * (c * xd_ref[t]) + i_g * g_g
        h_new = o_g * jnp.tanh(c_new)
        hs_ref[t] = h_new
        return (h_new, c_new)

    h, c = lax.fori_loop(0, TB, step, (h_sc[...], c_sc[...]), unroll=True)

    h_sc[...] = h
    c_sc[...] = c
    # Resident output: VMEM store every block, single HBM writeback at grid end.
    cT_ref[...] = c


def my_model_forward_seq(xs, xds, hidden, cell, params, *, block_steps=8):
    """Runs T recurrent steps with ONE pallas_call over grid=(T//TB,).

    Returns (outs (T,B,I), h_T (B,H), cell_T (1,B,H)).
    """
    T, B, I = xs.shape
    H = hidden.shape[-1]
    assert T >= 1, "sequence kernel requires at least one timestep"
    c2d = cell.reshape(B, H)

    # Pick TB dividing T (amortizes per-grid-step overhead over TB steps).
    TB = min(block_steps, T)
    while T % TB:
        TB -= 1

    # Hoisted non-recurrent input projection: one full-row batched matmul.
    xg = (xs.reshape(T * B, I) @ params["w_ih_T"] + params["b"]).reshape(T, B, 4 * H)

    grid_spec = pltpu.PrefetchScalarGridSpec(
        num_scalar_prefetch=0,
        grid=(T // TB,),
        in_specs=[
            pl.BlockSpec((TB, B, 4 * H), lambda t: (t, 0, 0)),   # xgates block
            pl.BlockSpec((TB, B, 1), lambda t: (t, 0, 0)),       # x_d block
            pl.BlockSpec((B, H), lambda t: (0, 0)),              # h0 (resident)
            pl.BlockSpec((B, H), lambda t: (0, 0)),              # c0 (resident)
            pl.BlockSpec((H, 4 * H), lambda t: (0, 0)),          # w_hh_T (resident)
        ],
        out_specs=[
            pl.BlockSpec((TB, B, H), lambda t: (t, 0, 0)),       # per-step h
            pl.BlockSpec((B, H), lambda t: (0, 0)),              # final c (resident)
        ],
        scratch_shapes=[pltpu.VMEM((B, H), jnp.float32),
                        pltpu.VMEM((B, H), jnp.float32)],
    )

    flops = T * 2 * B * H * 4 * H
    bytes_accessed = 4 * (T * B * 4 * H + T * B + T * B * H + H * 4 * H + 3 * B * H)

    hs, cT = pl.pallas_call(
        _lstm_seq_kernel,
        grid_spec=grid_spec,
        out_shape=(
            jax.ShapeDtypeStruct((T, B, H), jnp.float32),
            jax.ShapeDtypeStruct((B, H), jnp.float32),
        ),
        compiler_params=pltpu.CompilerParams(
            dimension_semantics=("arbitrary",)),
        cost_estimate=pl.CostEstimate(flops=flops,
                                      transcendentals=T * 5 * B * H,
                                      bytes_accessed=bytes_accessed),
    )(xg, xds, hidden, c2d, params["w_hh_T"])

    # Hoisted non-recurrent fc projection: one full-row batched matmul.
    outs = (hs.reshape(T * B, H) @ params["fc_w_T"] + params["fc_b"]).reshape(T, B, I)
    hT = hs[-1]
    return outs, hT, cT.reshape(1, B, H)


# ---------------------------------------------------------------------------
# Parameters
# ---------------------------------------------------------------------------
def init_params(key, input_size, hidden_size):
    """Deterministic synthetic parameters matching nn.LSTM + nn.Linear shapes."""
    I, H = input_size, hidden_size
    assert I + 2 * H <= LANES, "single-step output slab packing assumes I + 2H <= 128"

    ks = jax.random.split(key, 6)
    scale = 1.0 / jnp.sqrt(H)
    w_ih = jax.random.uniform(ks[0], (4 * H, I), minval=-scale, maxval=scale,
                              dtype=jnp.float32)
    w_hh = jax.random.uniform(ks[1], (4 * H, H), minval=-scale, maxval=scale,
                              dtype=jnp.float32)
    b_ih = jax.random.uniform(ks[2], (4 * H,), minval=-scale, maxval=scale,
                              dtype=jnp.float32)
    b_hh = jax.random.uniform(ks[3], (4 * H,), minval=-scale, maxval=scale,
                              dtype=jnp.float32)
    fc_w = jax.random.uniform(ks[4], (I, H), minval=-scale, maxval=scale,
                              dtype=jnp.float32)
    fc_b = jax.random.uniform(ks[5], (I,), minval=-scale, maxval=scale,
                              dtype=jnp.float32)

    bias = (b_ih + b_hh).reshape(1, 4 * H)

    # Merged lane-dense placement selector for the single-step output slab:
    # [h_new | c_new] @ hc_sel -> lanes 0:I fc(h), I:I+H h_new, I+H:I+2H c_new.
    eye = jnp.eye(H, dtype=jnp.float32)
    hc_sel = jnp.zeros((2 * H, LANES), jnp.float32)
    hc_sel = hc_sel.at[:H, :I].set(fc_w.T)
    hc_sel = hc_sel.at[:H, I:I + H].set(eye)
    hc_sel = hc_sel.at[H:, I + H:I + 2 * H].set(eye)
    fcb_pad = jnp.zeros((1, LANES), jnp.float32).at[0, :I].set(fc_b)

    return {
        "w_ih_T": w_ih.T,                    # (I, 4H)
        "w_hh_T": w_hh.T,                    # (H, 4H)
        "b": bias,                           # (1, 4H)
        "fc_w_T": fc_w.T,                    # (H, I)
        "fc_b": fc_b.reshape(1, -1),         # (1, I)
        "hc_sel": hc_sel,                    # (2H, 128)
        "fcb_pad": fcb_pad,                  # (1, 128)
    }


# ---------------------------------------------------------------------------
# Test
# ---------------------------------------------------------------------------
if __name__ == "__main__":
    input_size = 8
    hidden_size = 32
    batch = 8
    seq_len = 16

    key = jax.random.PRNGKey(0)
    kp, kx, kd, ks, ksd = jax.random.split(key, 5)

    params = init_params(kp, input_size, hidden_size)

    x = jax.random.normal(kx, (batch, input_size), dtype=jnp.float32)
    x_d = jax.random.uniform(kd, (batch, 1), dtype=jnp.float32)  # time-decay
    hidden = jnp.zeros((batch, hidden_size), dtype=jnp.float32)
    cell = jnp.zeros((1, batch, hidden_size), dtype=jnp.float32)

    # Pure-JAX reference for one step.
    def ref_step(x_, xd_, h_, c_):
        H = hidden_size
        gates = x_ @ params["w_ih_T"] + h_ @ params["w_hh_T"] + params["b"]
        i_g = jax.nn.sigmoid(gates[:, :H])
        f_g = jax.nn.sigmoid(gates[:, H:2 * H])
        g_g = jnp.tanh(gates[:, 2 * H:3 * H])
        o_g = jax.nn.sigmoid(gates[:, 3 * H:])
        c_n = f_g * (c_ * xd_) + i_g * g_g
        h_n = o_g * jnp.tanh(c_n)
        o_n = h_n @ params["fc_w_T"] + params["fc_b"]
        return o_n, h_n, c_n

    # --- single-step forward (module semantics) ---
    out, h_new, c_new = my_model_forward(x, x_d, hidden, cell, params)
    jax.block_until_ready((out, h_new, c_new))

    assert out.shape == (batch, input_size)
    assert h_new.shape == (batch, hidden_size)
    assert c_new.shape == (1, batch, hidden_size)

    o_r, h_r, c_r = ref_step(x, x_d, hidden, cell[0])
    assert jnp.allclose(out, o_r, atol=1e-5)
    assert jnp.allclose(h_new, h_r, atol=1e-5)
    assert jnp.allclose(c_new[0], c_r, atol=1e-5)

    # --- fused time-loop forward ---
    xs = jax.random.normal(ks, (seq_len, batch, input_size), dtype=jnp.float32)
    xds = jax.random.uniform(ksd, (seq_len, batch, 1), dtype=jnp.float32)
    outs, hT, cT = my_model_forward_seq(xs, xds, hidden, cell, params)
    jax.block_until_ready((outs, hT, cT))

    h_r, c_r = hidden, cell[0]
    for t in range(seq_len):
        o_r, h_r, c_r = ref_step(xs[t], xds[t], h_r, c_r)
        assert jnp.allclose(outs[t], o_r, atol=1e-4)
    assert jnp.allclose(hT, h_r, atol=1e-4)
    assert jnp.allclose(cT[0], c_r, atol=1e-4)

    print("KERNEL_OK")
</pallas_src>

<mosaic_0001>
module attributes {stable_mosaic.version = 11 : i64} {
  func.func @_lstm_step_kernel(%arg0: memref<8x8xf32, #tpu.memory_space<vmem>>, %arg1: memref<8x1xf32, #tpu.memory_space<vmem>>, %arg2: memref<8x32xf32, #tpu.memory_space<vmem>>, %arg3: memref<8x32xf32, #tpu.memory_space<vmem>>, %arg4: memref<8x128xf32, #tpu.memory_space<vmem>>, %arg5: memref<32x128xf32, #tpu.memory_space<vmem>>, %arg6: memref<1x128xf32, #tpu.memory_space<vmem>>, %arg7: memref<64x128xf32, #tpu.memory_space<vmem>>, %arg8: memref<1x128xf32, #tpu.memory_space<vmem>>, %arg9: memref<8x128xf32, #tpu.memory_space<vmem>>) attributes {dimension_semantics = [], scalar_prefetch = 0 : i64, scratch_operands = 0 : i64, tpu.core_type = #tpu.core_type<tc>} {
    %c0 = arith.constant 0 : index
    %c0_0 = arith.constant 0 : index
    %0 = vector.load %arg0[%c0, %c0_0] : memref<8x8xf32, #tpu.memory_space<vmem>>, vector<8x8xf32>
    %c0_1 = arith.constant 0 : index
    %c0_2 = arith.constant 0 : index
    %1 = vector.load %arg4[%c0_1, %c0_2] : memref<8x128xf32, #tpu.memory_space<vmem>>, vector<8x128xf32>
    %cst = arith.constant dense<0.000000e+00> : vector<8x128xf32>
    %2 = tpu.matmul %0, %1, %cst {dimension_numbers = #tpu.dot_dimension_numbers<[1], [0], [0], [1], [0, 0, 1, 1], [], []>} : vector<8x8xf32>, vector<8x128xf32>, vector<8x128xf32> -> vector<8x128xf32>
    %c0_3 = arith.constant 0 : index
    %c0_4 = arith.constant 0 : index
    %3 = vector.load %arg2[%c0_3, %c0_4] : memref<8x32xf32, #tpu.memory_space<vmem>>, vector<8x32xf32>
    %c0_5 = arith.constant 0 : index
    %c0_6 = arith.constant 0 : index
    %4 = vector.load %arg5[%c0_5, %c0_6] : memref<32x128xf32, #tpu.memory_space<vmem>>, vector<32x128xf32>
    %cst_7 = arith.constant dense<0.000000e+00> : vector<8x128xf32>
    %5 = tpu.matmul %3, %4, %cst_7 {dimension_numbers = #tpu.dot_dimension_numbers<[1], [0], [0], [1], [0, 0, 1, 1], [], []>} : vector<8x32xf32>, vector<32x128xf32>, vector<8x128xf32> -> vector<8x128xf32>
    %6 = arith.addf %2, %5 : vector<8x128xf32>
    %c0_8 = arith.constant 0 : index
    %c0_9 = arith.constant 0 : index
    %7 = vector.load %arg6[%c0_8, %c0_9] : memref<1x128xf32, #tpu.memory_space<vmem>>, vector<1x128xf32>
    %8 = vector.broadcast %7 : vector<1x128xf32> to vector<8x128xf32>
    %9 = arith.addf %6, %8 : vector<8x128xf32>
    %10 = vector.extract_strided_slice %9 {offsets = [0, 0], sizes = [8, 32], strides = [1, 1]} : vector<8x128xf32> to vector<8x32xf32>
    %11 = arith.negf %10 : vector<8x32xf32>
    %12 = math.exp %11 : vector<8x32xf32>
    %cst_10 = arith.constant 1.000000e+00 : f32
    %13 = vector.broadcast %cst_10 : f32 to vector<8x32xf32>
    %14 = arith.addf %13, %12 : vector<8x32xf32>
    %15 = arith.divf %13, %14 : vector<8x32xf32>
    %16 = vector.extract_strided_slice %9 {offsets = [0, 32], sizes = [8, 32], strides = [1, 1]} : vector<8x128xf32> to vector<8x32xf32>
    %17 = arith.negf %16 : vector<8x32xf32>
    %18 = math.exp %17 : vector<8x32xf32>
    %cst_11 = arith.constant 1.000000e+00 : f32
    %19 = vector.broadcast %cst_11 : f32 to vector<8x32xf32>
    %20 = arith.addf %19, %18 : vector<8x32xf32>
    %21 = arith.divf %19, %20 : vector<8x32xf32>
    %22 = vector.extract_strided_slice %9 {offsets = [0, 64], sizes = [8, 32], strides = [1, 1]} : vector<8x128xf32> to vector<8x32xf32>
    %23 = math.tanh %22 : vector<8x32xf32>
    %24 = vector.extract_strided_slice %9 {offsets = [0, 96], sizes = [8, 32], strides = [1, 1]} : vector<8x128xf32> to vector<8x32xf32>
    %25 = arith.negf %24 : vector<8x32xf32>
    %26 = math.exp %25 : vector<8x32xf32>
    %cst_12 = arith.constant 1.000000e+00 : f32
    %27 = vector.broadcast %cst_12 : f32 to vector<8x32xf32>
    %28 = arith.addf %27, %26 : vector<8x32xf32>
    %29 = arith.divf %27, %28 : vector<8x32xf32>
    %c0_13 = arith.constant 0 : index
    %c0_14 = arith.constant 0 : index
    %30 = vector.load %arg3[%c0_13, %c0_14] : memref<8x32xf32, #tpu.memory_space<vmem>>, vector<8x32xf32>
    %c0_15 = arith.constant 0 : index
    %c0_16 = arith.constant 0 : index
    %31 = vector.load %arg1[%c0_15, %c0_16] : memref<8x1xf32, #tpu.memory_space<vmem>>, vector<8x1xf32>
    %32 = vector.broadcast %31 : vector<8x1xf32> to vector<8x32xf32>
    %33 = arith.mulf %30, %32 : vector<8x32xf32>
    %34 = arith.mulf %21, %33 : vector<8x32xf32>
    %35 = arith.mulf %15, %23 : vector<8x32xf32>
    %36 = arith.addf %34, %35 : vector<8x32xf32>
    %37 = math.tanh %36 : vector<8x32xf32>
    %38 = arith.mulf %29, %37 : vector<8x32xf32>
    %39 = tpu.concatenate %38, %36 in 1 : vector<8x32xf32>, vector<8x32xf32> -> vector<8x64xf32>
    %c0_17 = arith.constant 0 : index
    %c0_18 = arith.constant 0 : index
    %40 = vector.load %arg7[%c0_17, %c0_18] : memref<64x128xf32, #tpu.memory_space<vmem>>, vector<64x128xf32>
    %cst_19 = arith.constant dense<0.000000e+00> : vector<8x128xf32>
    %41 = tpu.matmul %39, %40, %cst_19 {dimension_numbers = #tpu.dot_dimension_numbers<[1], [0], [0], [1], [0, 0, 1, 1], [], []>} : vector<8x64xf32>, vector<64x128xf32>, vector<8x128xf32> -> vector<8x128xf32>
    %c0_20 = arith.constant 0 : index
    %c0_21 = arith.constant 0 : index
    %42 = vector.load %arg8[%c0_20, %c0_21] : memref<1x128xf32, #tpu.memory_space<vmem>>, vector<1x128xf32>
    %43 = vector.broadcast %42 : vector<1x128xf32> to vector<8x128xf32>
    %44 = arith.addf %41, %43 : vector<8x128xf32>
    %c0_22 = arith.constant 0 : index
    %c0_23 = arith.constant 0 : index
    %45 = vector.load %arg9[%c0_22, %c0_23] : memref<8x128xf32, #tpu.memory_space<vmem>>, vector<8x128xf32>
    tpu.vector_store %arg9[%c0_22, %c0_23], %44 {strides = array<i32>} : memref<8x128xf32, #tpu.memory_space<vmem>>, vector<8x128xf32>,
    return
  }
}

</mosaic_0001>

<bundles_post_ra>
// kernel: tpu_custom_call.1
= control target key start
LH: loop header
LB: loop body
LE: loop exit
PB: predicated region body
PF: predicated region fallthrough
CT: control target
= control target key end

     0   :  { %14 = vsyncpa [#allocation3], 0  ;;  %s722_s0 = inlined_call_operand.vmem [shape: f32[8,8], index: 0, kind: input, shape index: {}]   ;;  %s723_s1 = inlined_call_operand.vmem [shape: f32[8,1], index: 1, kind: input, shape index: {}]   ;;  %s724_s2 = inlined_call_operand.vmem [shape: f32[8,32], index: 2, kind: input, shape index: {}]   ;;  %s725_s3 = inlined_call_operand.hbm [shape: f32[8,32], index: 3, kind: input, shape index: {}]   ;;  %s726_s4 = inlined_call_operand.vmem [shape: f32[8,128], index: 4, kind: input, shape index: {}]   ;;  %s727_s5 = inlined_call_operand.hbm [shape: f32[32,128], index: 5, kind: input, shape index: {}]   ;;  %s728_s6 = inlined_call_operand.vmem [shape: f32[1,128], index: 6, kind: input, shape index: {}]   ;;  %s729_s7 = inlined_call_operand.hbm [shape: f32[64,128], index: 7, kind: input, shape index: {}]   ;;  %s730_s8 = inlined_call_operand.vmem [shape: f32[1,128], index: 8, kind: input, shape index: {}]   ;;  %s731_s9 = inlined_call_operand.hbm [shape: f32[8,128], index: 9, kind: output, shape index: {}]  }
   0x1   :  { %15 = vsyncpa [#allocation6], 0 }
   0x2   :  { %16 = vsyncpa [#allocation4], 0  ;;  %s572_s30 = smov [#allocation5]   ;;  %s478_s13 = scalar_lea.hbm %s727_s5, 512 }
   0x3   :  { %s40_s10 = sshll.u32 %s572_s30, 4  ;;  %p479_p0 = scmp.ne.s32.totalorder %s727_s5, %s478_s13  ;;  %s41_s10 = int_to_ptr.vmem [resolvable:$true] %s40_s10 }
   0x4   :  { %p482_p1 = scmp.lt.u32.totalorder %s478_s13, %s727_s5 }
   0x6   :  { %p484_p2 = pnand %p482_p1, %p479_p0 }
   0x8   :  { %487 = shalt.err (!%p484_p2)
}
   0x9   :  { %s488_s18 = scalar_lea.vmem %s41_s10, 512  ;;  %p493_p4 = scmp.lt.s32.totalorder %s41_s10, %s41_s10 }
   0xa   :  { %p489_p3 = scmp.ne.s32.totalorder %s41_s10, %s488_s18  ;;  %p494_p5 = scmp.lt.s32.totalorder %s488_s18, %s488_s18 }
   0xc   :  { %p495_p6 = por %p494_p5, %p493_p4 }
   0xe   :  { %p496_p7 = pnand %p495_p6, %p489_p3 }
  0x10   :  { %499 = shalt.err (!%p496_p7)
}
  0x11   :  { %s573_s19 = smov 128   ;;  %s574_s20 = smov 8  }
  0x12   :  { %46 = dma.hbm_to_vmem [thread:$0]  %s727_s5, 512, %s41_s10, [#allocation6], %s573_s19, %s573_s19, %s574_s20  }
  0x13   :  { %s575_s23 = smov [#allocation2]   ;;  %s576_s25 = smov [#allocation7]  }
  0x14   :  { %s29_s24 = sshll.u32 %s575_s23, 4  ;;  %s54_s26 = sshll.u32 %s576_s25, 4  ;;  %s30_s24 = int_to_ptr.vmem [resolvable:$true] %s29_s24  ;;  %s55_s26 = int_to_ptr.vmem [resolvable:$true] %s54_s26 }
  0x15   :  { %s500_s29 = scalar_lea.hbm %s725_s3, 128 }
  0x16   :  { %p501_p8 = scmp.ne.s32.totalorder %s725_s3, %s500_s29  ;;  %p504_p9 = scmp.lt.u32.totalorder %s500_s29, %s725_s3 }
  0x18   :  { %p506_p10 = pnand %p504_p9, %p501_p8 }
  0x1a   :  { %509 = shalt.err (!%p506_p10)
}
  0x1b   :  { %s510_s5 = scalar_lea.vmem %s30_s24, 128  ;;  %p515_p12 = scmp.lt.s32.totalorder %s30_s24, %s30_s24 }
  0x1c   :  { %p511_p11 = scmp.ne.s32.totalorder %s30_s24, %s510_s5  ;;  %p516_p13 = scmp.lt.s32.totalorder %s510_s5, %s510_s5 }
  0x1e   :  { %p517_p0 = por %p516_p13, %p515_p12 }
  0x20   :  { %p518_p1 = pnand %p517_p0, %p511_p11 }
  0x22   :  { %521 = shalt.err (!%p518_p1)
}
  0x23   :  { %32 = dma.hbm_to_vmem [thread:$0]  %s725_s3, 128, %s30_s24, [#allocation3]  }
  0x24   :  { %s522_s17 = scalar_lea.hbm %s729_s7, 1024 }
  0x25   :  { %p523_p2 = scmp.ne.s32.totalorder %s729_s7, %s522_s17  ;;  %p526_p3 = scmp.lt.u32.totalorder %s522_s17, %s729_s7 }
  0x27   :  { %p528_p4 = pnand %p526_p3, %p523_p2 }
  0x29   :  { %531 = shalt.err (!%p528_p4)
}
  0x2a   :  { %s532_s25 = scalar_lea.vmem %s55_s26, 1024  ;;  %p537_p6 = scmp.lt.s32.totalorder %s55_s26, %s55_s26 }
  0x2b   :  { %p533_p5 = scmp.ne.s32.totalorder %s55_s26, %s532_s25  ;;  %p538_p7 = scmp.lt.s32.totalorder %s532_s25, %s532_s25 }
  0x2d   :  { %p539_p8 = por %p538_p7, %p537_p6 }
  0x2f   :  { %p540_p9 = pnand %p539_p8, %p533_p5 }
  0x31   :  { %543 = shalt.err (!%p540_p9)
}
  0x32   :  { %60 = dma.hbm_to_vmem [thread:$0]  %s729_s7, 1024, %s55_s26, [#allocation6], %s573_s19, %s573_s19, %s574_s20  }
  0x33   :  { %566 = dma.done.wait [#allocation3], 128  }
  0x34   :  { %567 = vsyncadd [#allocation3], 4294967168 }
  0x35   :  { %568 = dma.done.wait [#allocation6], 1536  }
  0x36   :  { %569 = vsyncadd [#allocation6], 4294965760  ;;  %v577_v0 = vmov 0.0|0.0   ;;  %vm578_vm0 = vmmov 0   ;;  %v579_v1 = vmov 0.0   ;;  %v580_v2 = vmov 0  }
  0x37   :  { %439 = vmatprep.subr.bf16.mxu0 %v577_v0  ;;  %412 = vmatprep.mubr.msk.f32.mxu0 %vm578_vm0, %v579_v1  ;;  %v75_v3 = vld [vmem:[#allocation5] sm:$0xff]  ;;  %v76_v4 = vld [vmem:[#allocation5 + $0x8] sm:$0xff]  ;;  %v77_v5 = vld [vmem:[#allocation5 + $0x10] sm:$0xff]  ;;  %vm79_vm1 = vcmask 261120   ;;  %vm153_vm2 = vcmask 64512   ;;  %vm291_vm3 = vcmask 523264  }
  0x38   :  { %469 = vset.pattern.permute.xlu0 %v580_v2  ;;  %445 = vmatprep.subr.bf16.mxu1 %v577_v0  ;;  %v440_v6 = vpack.c.bf16 %v76_v4, %v75_v3  ;;  %v78_v7 = vld [vmem:[#allocation5 + $0x18] sm:$0xff]  ;;  %v276_v34 = vld [vmem:[#allocation7] sm:$0xff]  ;;  %v277_v35 = vld [vmem:[#allocation7 + $0x8] sm:$0xff]  ;;  %s583_s12 = smov [#allocation8]  }
  0x39   :  { %436 = vmatprep.mubr.msk.f32.mxu1 %vm578_vm0, %v579_v1  ;;  %v243_v8 = vld [vmem:[%s723_s1] sm:$0xff]  ;;  %v443_v9 = vpack.c.bf16 %v78_v7, %v77_v5  ;;  %v278_v36 = vld [vmem:[#allocation7 + $0x10] sm:$0xff]  ;;  %v446_v37 = vpack.c.bf16 %v277_v35, %v276_v34  ;;  %v280_v40 = vld [vmem:[#allocation7 + $0x20] sm:$0xff]  ;;  %s372_s13 = sshll.u32 %s583_s12, 4  ;;  %s373_s13 = int_to_ptr.vmem [resolvable:$true] %s372_s13 }
  0x3a   :  { %246 = vperm.xlu0 %469, %v243_v8   ;;  %441 = vmatpush3.bf16.msra.mxu0 %v440_v6  ;;  %v74_v10 = vld [vmem:[%s724_s2] sm:$0xff]  ;;  %s581_s2 = smov 32   ;;  %v281_v41 = vld [vmem:[#allocation7 + $0x28] sm:$0xff]  ;;  %v282_v43 = vld [vmem:[#allocation7 + $0x30] sm:$0xff]  ;;  %s544_s5 = scalar_lea.vmem %s373_s13, 128 }
  0x3b   :  { %442 = vmatprep.subr.bf16.mxu0 %v577_v0  ;;  %v73_v11 = vld [vmem:[%s726_s4] sm:$0xff]  ;;  %447 = vmatpush3.bf16.msra.mxu1 %v446_v37  ;;  %v452_v42 = vpack.c.bf16 %v281_v41, %v280_v40  ;;  %p545_p10 = scmp.ne.s32.totalorder %s373_s13, %s544_s5  ;;  %p549_p11 = scmp.lt.s32.totalorder %s373_s13, %s373_s13 }
  0x3c   :  { %v72_v12 = vld [vmem:[%s722_s0] sm:$0xff]  ;;  %s582_s0 = smov 64   ;;  %448 = vmatprep.subr.bf16.mxu1 %v577_v0  ;;  %p550_p12 = scmp.lt.s32.totalorder %s544_s5, %s544_s5 }
  0x3d   :  { %v242_v13 = vld [vmem:[#allocation2] sm:$0xff] }
  0x3e   :  { %444 = vmatpush3.bf16.msra.mxu0 %v443_v9  ;;  %v384_v19 = vld [vmem:[%s728_s6] ss:$0 sm:$0xff]  ;;  %p551_p13 = por %p550_p12, %p549_p11 }
  0x3f   :  { %415 = vmatprep.subr.mxu0 %v579_v1  ;;  %v279_v38 = vld [vmem:[#allocation7 + $0x18] sm:$0xff] }
  0x40   :  { %v449_v39 = vpack.c.bf16 %v279_v38, %v278_v36  ;;  %v283_v44 = vld [vmem:[#allocation7 + $0x38] sm:$0xff]  ;;  %p552_p0 = pnand %p551_p13, %p545_p10 }
  0x41   :  { %413 = vmatmul.mubr.msk.f32.vlgmr.msra.gmra.mrb[0].mxu0 %vm79_vm1, %v74_v10  ;;  %v455_v46 = vpack.c.bf16 %v283_v44, %v282_v43  ;;  %v386_v51 = vld [vmem:[%s730_s8] ss:$0 sm:$0xff] }
  0x42   :  { %416 = vmatpush3.msra.mxu0 %v73_v11  ;;  %417 = vmatprep.mubr.msk.f32.mxu0 %vm578_vm0, %v579_v1 }
  0x43   :  { %450 = vmatpush3.bf16.msra.mxu1 %v449_v39 }
  0x44   :  { %451 = vmatprep.subr.bf16.mxu1 %v577_v0 }
  0x45   :  { %418 = vmatmul.mubr.msk.f32.vlgmr.msra.gmra.mrb[2].mxu0 %vm153_vm2, %v72_v12 }
  0x47   :  { %453 = vmatpush3.bf16.msra.mxu1 %v452_v42 }
  0x48   :  { %454 = vmatprep.subr.bf16.mxu1 %v577_v0 }
  0x4b   :  { %456 = vmatpush3.bf16.msra.mxu1 %v455_v46 }
  0xb9   :  { %v247_v14 = vpop.permute.xlu0 %246 }
  0xba   :  { %v249_v15 = vmul.f32 %v247_v14, %v242_v13 }
  0xbc   :  { %251 = vrot.lane.b32.xlu1 %v249_v15, %s581_s2 }
 0x114   :  { %v149_v16 = vpop.f32.mrb[0].mxu0 }
 0x115   :  { %v414_v17 = vpop.f32.mrb[1].mxu0 }
 0x118   :  { %v223_v18 = vpop.f32.mrb[2].mxu0 }
 0x119   :  { %v224_v20 = vadd.f32 %v223_v18, %v149_v16  ;;  %v419_v21 = vpop.f32.mrb[3].mxu0 }
 0x11b   :  { %v234_v22 = vadd.f32 %v384_v19, %v224_v20 }
 0x11d   :  { %470 = vtanh.f32 %v234_v22  ;;  %v385_v24 = vmul.f32 -1.442695, %v234_v22 }
 0x11f   :  { %472 = vpow2.f32 %v385_v24 }
 0x127   :  { %v471_v23 = vpop.eup %470 }
 0x128   :  { %256 = vrot.lane.b32.xlu0 %v471_v23, %s582_s0 }
 0x129   :  { %v473_v25 = vpop.eup %472 }
 0x12a   :  { %v238_v26 = vadd.f32 1.0, %v473_v25 }
 0x12c   :  { %474 = vrcp.f32 %v238_v26 }
 0x12e   :  { %v252_v30 = vpop.permute.xlu1 %251 }
 0x136   :  { %v475_v27 = vpop.eup %474 }
 0x137   :  { %v254_v31 = vmul.f32 %v475_v27, %v252_v30 }
 0x19a   :  { %v257_v28 = vpop.permute.xlu0 %256 }
 0x19b   :  { %v259_v29 = vmul.f32 %v475_v27, %v257_v28 }
 0x19d   :  { %261 = vrot.lane.b32.xlu1 %v259_v29, %s581_s2 }
 0x20f   :  { %v262_v32 = vpop.permute.xlu1 %261 }
 0x210   :  { %v264_v33 = vadd.f32 %v262_v32, %v254_v31 }
 0x212   :  { %476 = vtanh.f32 %v264_v33 }
 0x21c   :  { %v477_v45 = vpop.eup %476 }
 0x21d   :  { %267 = vrot.lane.b32.xlu0 %v477_v45, %s582_s0 }
 0x28f   :  { %v268_v47 = vpop.permute.xlu0 %267 }
 0x290   :  { %v270_v48 = vmul.f32 %v475_v27, %v268_v47 }
 0x292   :  { %272 = vrot.lane.b32.xlu1 %v270_v48, %s581_s2 }
 0x304   :  { %v273_v49 = vpop.permute.xlu1 %272 }
 0x305   :  { %v275_v50 = vsel %vm79_vm1, %v273_v49, %v264_v33 }
 0x306   :  { %437 = vmatmul.mubr.msk.f32.vlgmr.msra.gmra.mrb[0].mxu1 %vm291_vm3, %v275_v50 }
 0x3d9   :  { %v361_v52 = vpop.f32.mrb[0].mxu1 }
 0x3da   :  { %v362_v53 = vadd.f32 %v386_v51, %v361_v52  ;;  %v438_v54 = vpop.f32.mrb[1].mxu1 }
 0x3dc   :  { %365 = vst [vmem:[#allocation8] sm:$0xff] %v362_v53 }
 0x3dd   :  { %555 = shalt.err (!%p552_p0)
}
 0x3de   :  { %s556_s15 = scalar_lea.hbm %s731_s9, 128 }
 0x3df   :  { %p557_p1 = scmp.ne.s32.totalorder %s731_s9, %s556_s15  ;;  %p560_p2 = scmp.lt.u32.totalorder %s556_s15, %s731_s9 }
 0x3e1   :  { %p562_p3 = pnand %p560_p2, %p557_p1 }
 0x3e3   :  { %565 = shalt.err (!%p562_p3)
}
 0x3e4   :  { %375 = dma.vmem_to_hbm [thread:$0]  %s373_s13, 128, %s731_s9, [#allocation4]  }
 0x3e5   :  { %570 = dma.done.wait [#allocation4], 128  }
 0x3e6   :  { %571 = vsyncadd [#allocation4], 4294967168 }
 0x3e7   :  { %379 = vsyncpa [#allocation3], 1 }
 0x3e8   :  { %380 = vsyncpa [#allocation6], 1 }
 0x3e9   :  { %381 = vsyncpa [#allocation4], 1 }

</bundles_post_ra>
